<compile_context>
chip_gen: v5e
topology: v5e:2x2
jax: 0.10.0
libtpu: 0.0.40
codegen_flags: <defaults>
</compile_context>

<pallas_src>
import functools

import jax
import jax.numpy as jnp
from jax.experimental import pallas as pl
from jax.experimental.pallas import tpu as pltpu

im_sz = 24
scale = 3
glimps_width = 6

LANE = 128
SUBLANE = 8
MAX_TILE_B = 2048   # ~5.4 MiB VMEM at this tile (z + out double-buffers + weights)


def _round_up(x, m):
    return ((x + m - 1) // m) * m


# ----------------------------- RETINA (glue, plain JAX) -----------------------------

def _maxpool2d(x, k):
    # Non-overlapping max-pool, stride == kernel_size (matches F.max_pool2d default).
    if k == 1:
        return x
    B, C, H, W = x.shape
    return x.reshape(B, C, H // k, k, W // k, k).max(axis=(3, 5))


def retina_forward(x, l, *, im_sz, width, scale):
    """x: (B, C, H, W) float32, l: (B, 2) in [-1, 1]. Returns (B, scale*C, width, width)."""
    B, C, H, W = x.shape
    hw = width // 2
    padsz = (2 ** (scale - 1)) * hw
    x_pad = jnp.pad(x, ((0, 0), (0, 0), (padsz, padsz), (padsz, padsz)), mode="edge")

    # (im_sz * (l + 1) / 2) cast to int -> truncation toward zero (values are >= 0
    # for l in [-1, 1]; dynamic_slice clamps if l ever leaves that range).
    l_int = (im_sz * (l + 1.0) / 2.0).astype(jnp.int32)
    psz = 2 * (2 ** (scale - 1)) * hw  # full patch size (24 for defaults)

    def extract(xb, lb):
        return jax.lax.dynamic_slice(xb, (0, lb[0], lb[1]), (C, psz, psz))

    patch = jax.vmap(extract)(x_pad, l_int)  # (B, C, psz, psz)

    outs = [_maxpool2d(patch, 2 ** (scale - 1))]
    cntr = psz // 2
    halfsz = cntr
    for s in range(scale - 1, 0, -1):
        halfsz = halfsz // 2
        crop = patch[:, :, cntr - halfsz:cntr + halfsz, cntr - halfsz:cntr + halfsz]
        outs.append(_maxpool2d(crop, 2 ** (s - 1)))
    return jnp.concatenate(outs, axis=1)  # (B, scale*C, width, width)


# ----------------------------- Encoder (Pallas kernel) -----------------------------

def glimpse_encoder_kernel(z_ref, w1_ref, w2_ref, b2_ref, g_ref):
    # Layer 1 (fc_ro + fc_lc fused via block-diagonal W1, bias folded into the
    # constant-1 input column): one (TB, K1) x (K1, 256) MXU pass, f32 accumulate.
    h = jnp.dot(z_ref[...], w1_ref[...], preferred_element_type=jnp.float32)
    h = jnp.maximum(h, 0.0)                      # h = [hg | hl], f32 (VPU-native on v5e)
    # Layer 2 (fc_hg + fc_hl fused via row-concat W2): one (TB,256)x(256,256) MXU pass.
    g = jnp.dot(h.astype(w2_ref.dtype), w2_ref[...],
                preferred_element_type=jnp.float32) + b2_ref[...]
    g_ref[...] = jnp.maximum(g, 0.0).astype(g_ref.dtype)


def glimpse_encoder(z_pad, w1, w2, b2, tile_b, out_dtype=jnp.float32):
    """z_pad: (B_pad, K1) bf16, w1/w2 bf16, b2 f32. Returns (B_pad, 256) out_dtype."""
    B_pad, K1 = z_pad.shape
    N2 = w2.shape[1]
    grid = (B_pad // tile_b,)
    return pl.pallas_call(
        glimpse_encoder_kernel,
        out_shape=jax.ShapeDtypeStruct((B_pad, N2), out_dtype),
        grid=grid,
        in_specs=[
            pl.BlockSpec((tile_b, K1), lambda i: (i, 0)),        # z tile
            pl.BlockSpec((K1, w1.shape[1]), lambda i: (0, 0)),   # W1 (VMEM-resident)
            pl.BlockSpec((w2.shape[0], N2), lambda i: (0, 0)),   # W2 (VMEM-resident)
            pl.BlockSpec((1, N2), lambda i: (0, 0)),             # b2
        ],
        out_specs=pl.BlockSpec((tile_b, N2), lambda i: (i, 0)),  # lane-dense f32/bf16 slab
        compiler_params=pltpu.CompilerParams(
            dimension_semantics=("parallel",)),                  # v7x: shard across 2 TCs
    )(z_pad, w1, w2, b2)


def _choose_tiling(B):
    """Pick (tile_b, B_pad): big tiles to amortize grid-step overhead, >=2 grid
    steps once the batch is large enough to feed both v7x TensorCores."""
    B_sub = _round_up(max(B, 1), SUBLANE)
    if B_sub <= 256:
        tile_b = B_sub                      # tiny batch: one step; splitting is pure overhead
    else:
        half = _round_up((B_sub + 1) // 2, SUBLANE)
        tile_b = min(MAX_TILE_B, half)      # >= 2 steps, <= 2048 rows/tile
    B_pad = _round_up(B_sub, tile_b)
    return tile_b, B_pad


# ----------------------------- Parameters -----------------------------

def init_glimpse_params(key, channel, glimps_width, scale):
    d_ro = scale * glimps_width ** 2 * channel
    dims = [("w_ro", (d_ro, 128)), ("b_ro", (1, 128)),
            ("w_lc", (2, 128)),    ("b_lc", (1, 128)),
            ("w_hg", (128, 256)),  ("b_hg", (1, 256)),
            ("w_hl", (128, 256)),  ("b_hl", (1, 256))]
    fan_ins = {"w_ro": d_ro, "b_ro": d_ro, "w_lc": 2, "b_lc": 2,
               "w_hg": 128, "b_hg": 128, "w_hl": 128, "b_hl": 128}
    params = {}
    keys = jax.random.split(key, len(dims))
    for k, (name, shape) in zip(keys, dims):
        bound = 1.0 / jnp.sqrt(float(fan_ins[name]))
        params[name] = jax.random.uniform(k, shape, jnp.float32, -bound, bound)
    return params


def pack_glimpse_params(params):
    """Build the fused, MXU-friendly weights once at init time.

    Layer 1:  z = [ro | l | 1 | 0-pad]  (K padded to a multiple of 128),
              W1 = [[W_ro, 0], [0, W_lc], [b_ro, b_lc], [0, 0]]  ->  h = [hg | hl]
              (bias rides the same MXU pass through the constant-1 column).
    Layer 2:  W2 = [W_hg ; W_hl],  b2 = b_hg + b_hl  ->  g = relu(h @ W2 + b2).
    Zero-padded rows of W1 make the z padding numerically exact.
    """
    d_ro = params["w_ro"].shape[0]
    d_in = d_ro + 2 + 1                              # ro | l | bias-1 column
    K1 = _round_up(d_in, LANE)
    b1 = jnp.concatenate([params["b_ro"], params["b_lc"]], axis=-1)      # (1, 256)
    w1 = jnp.zeros((K1, 256), jnp.float32)
    w1 = w1.at[:d_ro, :128].set(params["w_ro"])
    w1 = w1.at[d_ro:d_ro + 2, 128:].set(params["w_lc"])
    w1 = w1.at[d_ro + 2, :].set(b1[0])                                   # folded bias row
    w2 = jnp.concatenate([params["w_hg"], params["w_hl"]], axis=0)       # (256, 256)
    b2 = params["b_hg"] + params["b_hl"]                                 # (1, 256)
    return {"w1": w1.astype(jnp.bfloat16),
            "w2": w2.astype(jnp.bfloat16),
            "b2": b2,
            "d_ro": d_ro}


# ----------------------------- GLIMPSE forward -----------------------------

@functools.partial(jax.jit, static_argnames=("out_dtype",))
def glimpse_forward(packed, x, l, out_dtype=jnp.float32):
    B = x.shape[0]
    ro = retina_forward(x, l, im_sz=im_sz, width=glimps_width, scale=scale)
    ro = ro.reshape(B, -1)                       # same C-order flatten as torch .view(B, -1)

    K1 = packed["w1"].shape[0]
    tile_b, B_pad = _choose_tiling(B)

    # [ro | l | 1] cast to bf16, then a single zero-pad to the (B_pad, K1) layout.
    z = jnp.concatenate([ro, l, jnp.ones((B, 1), ro.dtype)], axis=-1).astype(jnp.bfloat16)
    z_pad = jnp.pad(z, ((0, B_pad - B), (0, K1 - z.shape[1])))

    g_pad = glimpse_encoder(z_pad, packed["w1"], packed["w2"], packed["b2"],
                            tile_b, out_dtype=out_dtype)
    return g_pad[:B]


def glimpse_forward_ref(params, x, l):
    # Pure-JAX f32 reference matching the original PyTorch module.
    B = x.shape[0]
    ro = retina_forward(x, l, im_sz=im_sz, width=glimps_width, scale=scale).reshape(B, -1)
    hg = jnp.maximum(ro @ params["w_ro"] + params["b_ro"], 0.0)
    hl = jnp.maximum(l @ params["w_lc"] + params["b_lc"], 0.0)
    return jnp.maximum(hg @ params["w_hg"] + params["b_hg"]
                       + hl @ params["w_hl"] + params["b_hl"], 0.0)


if __name__ == "__main__":
    C = 1
    key = jax.random.PRNGKey(0)
    kx, kl, kp = jax.random.split(key, 3)
    params = init_glimpse_params(kp, C, glimps_width, scale)
    packed = pack_glimpse_params(params)

    # Small batch (single-tile grid).
    B = 2
    x = jax.random.normal(kx, (B, C, im_sz, im_sz), jnp.float32)
    l = jax.random.uniform(kl, (B, 2), jnp.float32, -1.0, 1.0)
    g = jax.block_until_ready(glimpse_forward(packed, x, l))
    g_ref = jax.block_until_ready(glimpse_forward_ref(params, x, l))
    assert g.shape == (B, 256)
    # bf16 weights/activations with f32 accumulation -> small drift vs the f32 reference.
    assert jnp.allclose(g, g_ref, atol=5e-2, rtol=5e-2), float(jnp.max(jnp.abs(g - g_ref)))

    # Larger batch (multi-step grid; exercises the >=2-step / big-tile path).
    B2 = 300
    kx2, kl2 = jax.random.split(jax.random.PRNGKey(1), 2)
    x2 = jax.random.normal(kx2, (B2, C, im_sz, im_sz), jnp.float32)
    l2 = jax.random.uniform(kl2, (B2, 2), jnp.float32, -1.0, 1.0)
    g2 = jax.block_until_ready(glimpse_forward(packed, x2, l2))
    g2_ref = jax.block_until_ready(glimpse_forward_ref(params, x2, l2))
    assert g2.shape == (B2, 256)
    assert jnp.allclose(g2, g2_ref, atol=5e-2, rtol=5e-2), float(jnp.max(jnp.abs(g2 - g2_ref)))

    print("KERNEL_OK")
</pallas_src>

<mosaic_0001>
module attributes {stable_mosaic.version = 11 : i64} {
  func.func @glimpse_encoder_kernel(%arg0: i32, %arg1: memref<8x128xbf16, #tpu.memory_space<vmem>>, %arg2: memref<128x256xbf16, #tpu.memory_space<vmem>>, %arg3: memref<256x256xbf16, #tpu.memory_space<vmem>>, %arg4: memref<1x256xf32, #tpu.memory_space<vmem>>, %arg5: memref<8x256xf32, #tpu.memory_space<vmem>>) attributes {dimension_semantics = [#tpu.dimension_semantics<parallel>], iteration_bounds = array<i64: 1>, scalar_prefetch = 0 : i64, scratch_operands = 0 : i64, tpu.core_type = #tpu.core_type<tc>, window_params = [{transform_indices = @transform_0, window_bounds = array<i64: 8, 128>}, {pipeline_mode = #tpu.pipeline_mode<synchronous>, transform_indices = @transform_1, window_bounds = array<i64: 128, 256>}, {pipeline_mode = #tpu.pipeline_mode<synchronous>, transform_indices = @transform_2, window_bounds = array<i64: 256, 256>}, {pipeline_mode = #tpu.pipeline_mode<synchronous>, transform_indices = @transform_3, window_bounds = array<i64: 1, 256>}, {transform_indices = @transform_4, window_bounds = array<i64: 8, 256>}]} {
    %c0 = arith.constant 0 : index
    %c0_0 = arith.constant 0 : index
    %0 = vector.load %arg1[%c0, %c0_0] : memref<8x128xbf16, #tpu.memory_space<vmem>>, vector<8x128xbf16>
    %c0_1 = arith.constant 0 : index
    %c0_2 = arith.constant 0 : index
    %1 = vector.load %arg2[%c0_1, %c0_2] : memref<128x256xbf16, #tpu.memory_space<vmem>>, vector<128x256xbf16>
    %cst = arith.constant dense<0.000000e+00> : vector<8x256xf32>
    %2 = tpu.matmul %0, %1, %cst {dimension_numbers = #tpu.dot_dimension_numbers<[1], [0], [0], [1], [0, 0, 1, 1], [], []>} : vector<8x128xbf16>, vector<128x256xbf16>, vector<8x256xf32> -> vector<8x256xf32>
    %cst_3 = arith.constant 0.000000e+00 : f32
    %3 = vector.broadcast %cst_3 : f32 to vector<8x256xf32>
    %4 = arith.maximumf %2, %3 : vector<8x256xf32>
    %5 = arith.truncf %4 : vector<8x256xf32> to vector<8x256xbf16>
    %c0_4 = arith.constant 0 : index
    %c0_5 = arith.constant 0 : index
    %6 = vector.load %arg3[%c0_4, %c0_5] : memref<256x256xbf16, #tpu.memory_space<vmem>>, vector<256x256xbf16>
    %cst_6 = arith.constant dense<0.000000e+00> : vector<8x256xf32>
    %7 = tpu.matmul %5, %6, %cst_6 {dimension_numbers = #tpu.dot_dimension_numbers<[1], [0], [0], [1], [0, 0, 1, 1], [], []>} : vector<8x256xbf16>, vector<256x256xbf16>, vector<8x256xf32> -> vector<8x256xf32>
    %c0_7 = arith.constant 0 : index
    %c0_8 = arith.constant 0 : index
    %8 = vector.load %arg4[%c0_7, %c0_8] : memref<1x256xf32, #tpu.memory_space<vmem>>, vector<1x256xf32>
    %9 = vector.broadcast %8 : vector<1x256xf32> to vector<8x256xf32>
    %10 = arith.addf %7, %9 : vector<8x256xf32>
    %cst_9 = arith.constant 0.000000e+00 : f32
    %11 = vector.broadcast %cst_9 : f32 to vector<8x256xf32>
    %12 = arith.maximumf %10, %11 : vector<8x256xf32>
    %c0_10 = arith.constant 0 : index
    %c0_11 = arith.constant 0 : index
    %13 = vector.load %arg5[%c0_10, %c0_11] : memref<8x256xf32, #tpu.memory_space<vmem>>, vector<8x256xf32>
    tpu.vector_store %arg5[%c0_10, %c0_11], %12 {strides = array<i32>} : memref<8x256xf32, #tpu.memory_space<vmem>>, vector<8x256xf32>,
    return
  }
  func.func @transform_0(%arg0: i32) -> (i32, i32) {
    %c0_i32 = arith.constant 0 : i32
    %c0_i32_0 = arith.constant 0 : i32
    return %arg0, %c0_i32 : i32, i32
  }
  func.func @transform_1(%arg0: i32) -> (i32, i32) {
    %c0_i32 = arith.constant 0 : i32
    %c0_i32_0 = arith.constant 0 : i32
    %c0_i32_1 = arith.constant 0 : i32
    return %c0_i32, %c0_i32_0 : i32, i32
  }
  func.func @transform_2(%arg0: i32) -> (i32, i32) {
    %c0_i32 = arith.constant 0 : i32
    %c0_i32_0 = arith.constant 0 : i32
    %c0_i32_1 = arith.constant 0 : i32
    return %c0_i32, %c0_i32_0 : i32, i32
  }
  func.func @transform_3(%arg0: i32) -> (i32, i32) {
    %c0_i32 = arith.constant 0 : i32
    %c0_i32_0 = arith.constant 0 : i32
    %c0_i32_1 = arith.constant 0 : i32
    return %c0_i32, %c0_i32_0 : i32, i32
  }
  func.func @transform_4(%arg0: i32) -> (i32, i32) {
    %c0_i32 = arith.constant 0 : i32
    %c0_i32_0 = arith.constant 0 : i32
    return %arg0, %c0_i32 : i32, i32
  }
}

</mosaic_0001>

<bundles_post_ra>
// kernel: custom-call
= control target key start
LH: loop header
LB: loop body
LE: loop exit
PB: predicated region body
PF: predicated region fallthrough
CT: control target
= control target key end

     0   :  { %s6_s0 = inlined_call_operand.vmem [shape: bf16[2,1,24,24], index: 0, kind: output, shape index: {}]  }

// kernel: glimpse_forward.1
= control target key start
LH: loop header
LB: loop body
LE: loop exit
PB: predicated region body
PF: predicated region fallthrough
CT: control target
= control target key end

     0   :  { %s967_s1 = inlined_call_operand.vmem [shape: bf16[128,256], index: 1, kind: input, shape index: {}]   ;;  %s968_s2 = inlined_call_operand.vmem [shape: bf16[256,256], index: 2, kind: input, shape index: {}]   ;;  %s969_s0 = inlined_call_operand.vmem [shape: bf16[8,128], index: 0, kind: input, shape index: {}]   ;;  %s970_s3 = inlined_call_operand.vmem [shape: f32[1,256], index: 3, kind: input, shape index: {}]   ;;  %s971_s4 = inlined_call_operand.vmem [shape: f32[8,256], index: 4, kind: output, shape index: {}]  }
   0x1   :  { %v460_v0 = vld [vmem:[%s967_s1 + $0x70] sm:$0xf]  ;;  %v609_v1 = vld [vmem:[%s967_s1 + $0x74] sm:$0xf0]  ;;  %v608_v2 = vld [vmem:[%s967_s1 + $0x74] sm:$0xf] }
   0x2   :  { %v461_v3 = vor.u32 %v609_v1, %v460_v0  ;;  %v462_v4 = vld [vmem:[%s967_s1 + $0x78] sm:$0xf0]  ;;  %v452_v5 = vld [vmem:[%s967_s1 + $0x60] sm:$0xf]  ;;  %v607_v6 = vld [vmem:[%s967_s1 + $0x64] sm:$0xf0] }
   0x3   :  { %v465_v7 = vor.u32 %v608_v2, %v462_v4  ;;  %v606_v8 = vld [vmem:[%s967_s1 + $0x64] sm:$0xf]  ;;  %v454_v9 = vld [vmem:[%s967_s1 + $0x68] sm:$0xf0]  ;;  %v453_v10 = vor.u32 %v607_v6, %v452_v5  ;;  %v444_v12 = vld [vmem:[%s967_s1 + $0x50] sm:$0xf] }
   0x4   :  { %114 = vmatpush.bf16.msra.mxu0 %v461_v3  ;;  %v457_v11 = vor.u32 %v606_v8, %v454_v9  ;;  %v605_v13 = vld [vmem:[%s967_s1 + $0x54] sm:$0xf0]  ;;  %v604_v14 = vld [vmem:[%s967_s1 + $0x54] sm:$0xf]  ;;  %v446_v15 = vld [vmem:[%s967_s1 + $0x58] sm:$0xf0] }
   0x5   :  { %127 = vmatpush.bf16.msra.mxu1 %v465_v7  ;;  %v445_v16 = vor.u32 %v605_v13, %v444_v12  ;;  %v449_v17 = vor.u32 %v604_v14, %v446_v15  ;;  %v436_v18 = vld [vmem:[%s967_s1 + $0x40] sm:$0xf]  ;;  %v603_v19 = vld [vmem:[%s967_s1 + $0x44] sm:$0xf0]  ;;  %v602_v20 = vld [vmem:[%s967_s1 + $0x44] sm:$0xf] }
   0x6   :  { %v438_v21 = vld [vmem:[%s967_s1 + $0x48] sm:$0xf0]  ;;  %v437_v22 = vor.u32 %v603_v19, %v436_v18  ;;  %v524_v23 = vld [vmem:[%s968_s2 + $0x70] sm:$0xf]  ;;  %v625_v24 = vld [vmem:[%s968_s2 + $0x74] sm:$0xf0] }
   0x7   :  { %v588_v25 = vld [vmem:[%s968_s2 + $0xf0] sm:$0xf]  ;;  %v441_v26 = vor.u32 %v602_v20, %v438_v21  ;;  %v601_v28 = vld [vmem:[%s967_s1 + $0x34] sm:$0xf0]  ;;  %v525_v29 = vor.u32 %v625_v24, %v524_v23  ;;  %v600_v31 = vld [vmem:[%s967_s1 + $0x34] sm:$0xf] }
   0x8   :  { %115 = vmatpush.bf16.msra.mxu0 %v453_v10  ;;  %v428_v27 = vld [vmem:[%s967_s1 + $0x30] sm:$0xf]  ;;  %v641_v30 = vld [vmem:[%s968_s2 + $0xf4] sm:$0xf0]  ;;  %v430_v32 = vld [vmem:[%s967_s1 + $0x38] sm:$0xf0] }
   0x9   :  { %128 = vmatpush.bf16.msra.mxu1 %v457_v11  ;;  %v589_v33 = vor.u32 %v641_v30, %v588_v25  ;;  %v516_v34 = vld [vmem:[%s968_s2 + $0x60] sm:$0xf]  ;;  %342 = vmatpush.bf16.msra.mxu2 %v525_v29  ;;  %v623_v35 = vld [vmem:[%s968_s2 + $0x64] sm:$0xf0]  ;;  %v429_v38 = vor.u32 %v601_v28, %v428_v27  ;;  %v433_v43 = vor.u32 %v600_v31, %v430_v32  ;;  %v598_v44 = vld [vmem:[%s967_s1 + $0x24] sm:$0xf] }
   0xa   :  { %v580_v36 = vld [vmem:[%s968_s2 + $0xe0] sm:$0xf]  ;;  %v639_v37 = vld [vmem:[%s968_s2 + $0xe4] sm:$0xf0]  ;;  %v517_v41 = vor.u32 %v623_v35, %v516_v34  ;;  %v508_v45 = vld [vmem:[%s968_s2 + $0x50] sm:$0xf] }
   0xb   :  { %v420_v39 = vld [vmem:[%s967_s1 + $0x20] sm:$0xf]  ;;  %v599_v40 = vld [vmem:[%s967_s1 + $0x24] sm:$0xf0]  ;;  %355 = vmatpush.bf16.msra.mxu3 %v589_v33  ;;  %v581_v42 = vor.u32 %v639_v37, %v580_v36  ;;  %v621_v46 = vld [vmem:[%s968_s2 + $0x54] sm:$0xf0] }
   0xc   :  { %116 = vmatpush.bf16.msra.mxu0 %v445_v16  ;;  %v422_v47 = vld [vmem:[%s967_s1 + $0x28] sm:$0xf0]  ;;  %v572_v48 = vld [vmem:[%s968_s2 + $0xd0] sm:$0xf]  ;;  %v637_v49 = vld [vmem:[%s968_s2 + $0xd4] sm:$0xf0]  ;;  %v509_v50 = vor.u32 %v621_v46, %v508_v45  ;;  %v421_v51 = vor.u32 %v599_v40, %v420_v39 }
   0xd   :  { %129 = vmatpush.bf16.msra.mxu1 %v449_v17  ;;  %343 = vmatpush.bf16.msra.mxu2 %v517_v41  ;;  %v412_v52 = vld [vmem:[%s967_s1 + $0x10] sm:$0xf]  ;;  %v573_v53 = vor.u32 %v637_v49, %v572_v48  ;;  %v500_v54 = vld [vmem:[%s968_s2 + $0x40] sm:$0xf]  ;;  %v619_v55 = vld [vmem:[%s968_s2 + $0x44] sm:$0xf0]  ;;  %v425_v56 = vor.u32 %v598_v44, %v422_v47 }
   0xe   :  { %v597_v57 = vld [vmem:[%s967_s1 + $0x14] sm:$0xf0]  ;;  %v564_v58 = vld [vmem:[%s968_s2 + $0xc0] sm:$0xf]  ;;  %v635_v59 = vld [vmem:[%s968_s2 + $0xc4] sm:$0xf0]  ;;  %v501_v63 = vor.u32 %v619_v55, %v500_v54 }
   0xf   :  { %356 = vmatpush.bf16.msra.mxu3 %v581_v42  ;;  %v596_v60 = vld [vmem:[%s967_s1 + $0x14] sm:$0xf]  ;;  %v414_v61 = vld [vmem:[%s967_s1 + $0x18] sm:$0xf0]  ;;  %v404_v62 = vld [vmem:[%s967_s1] sm:$0xf]  ;;  %v413_v0 = vor.u32 %v597_v57, %v412_v52  ;;  %v565_v2 = vor.u32 %v635_v59, %v564_v58 }
  0x10   :  { %117 = vmatpush.bf16.msra.mxu0 %v437_v22  ;;  %v595_v1 = vld [vmem:[%s967_s1 + $0x4] sm:$0xf0]  ;;  %v492_v3 = vld [vmem:[%s968_s2 + $0x30] sm:$0xf]  ;;  %v617_v4 = vld [vmem:[%s968_s2 + $0x34] sm:$0xf0]  ;;  %v417_v5 = vor.u32 %v596_v60, %v414_v61 }
  0x11   :  { %130 = vmatpush.bf16.msra.mxu1 %v441_v26  ;;  %344 = vmatpush.bf16.msra.mxu2 %v509_v50  ;;  %v594_v6 = vld [vmem:[%s967_s1 + $0x4] sm:$0xf]  ;;  %v556_v7 = vld [vmem:[%s968_s2 + $0xb0] sm:$0xf]  ;;  %v633_v8 = vld [vmem:[%s968_s2 + $0xb4] sm:$0xf0]  ;;  %v493_v14 = vor.u32 %v617_v4, %v492_v3  ;;  %v405_v15 = vor.u32 %v595_v1, %v404_v62 }
  0x12   :  { %v406_v9 = vld [vmem:[%s967_s1 + $0x8] sm:$0xf0]  ;;  %v624_v10 = vld [vmem:[%s968_s2 + $0x74] sm:$0xf]  ;;  %v526_v11 = vld [vmem:[%s968_s2 + $0x78] sm:$0xf0]  ;;  %v557_v16 = vor.u32 %v633_v8, %v556_v7 }
  0x13   :  { %357 = vmatpush.bf16.msra.mxu3 %v573_v53  ;;  %v640_v12 = vld [vmem:[%s968_s2 + $0xf4] sm:$0xf]  ;;  %v590_v13 = vld [vmem:[%s968_s2 + $0xf8] sm:$0xf0]  ;;  %v484_v17 = vld [vmem:[%s968_s2 + $0x20] sm:$0xf]  ;;  %v409_v19 = vor.u32 %v594_v6, %v406_v9  ;;  %v529_v20 = vor.u32 %v624_v10, %v526_v11 }
  0x14   :  { %118 = vmatpush.bf16.msra.mxu0 %v429_v38  ;;  %v615_v18 = vld [vmem:[%s968_s2 + $0x24] sm:$0xf0]  ;;  %v548_v21 = vld [vmem:[%s968_s2 + $0xa0] sm:$0xf]  ;;  %v593_v23 = vor.u32 %v640_v12, %v590_v13  ;;  %v622_v24 = vld [vmem:[%s968_s2 + $0x64] sm:$0xf] }
  0x15   :  { %131 = vmatpush.bf16.msra.mxu1 %v433_v43  ;;  %345 = vmatpush.bf16.msra.mxu2 %v501_v63  ;;  %v631_v22 = vld [vmem:[%s968_s2 + $0xa4] sm:$0xf0]  ;;  %v518_v25 = vld [vmem:[%s968_s2 + $0x68] sm:$0xf0]  ;;  %v638_v26 = vld [vmem:[%s968_s2 + $0xe4] sm:$0xf]  ;;  %v485_v28 = vor.u32 %v615_v18, %v484_v17 }
  0x16   :  { %v582_v27 = vld [vmem:[%s968_s2 + $0xe8] sm:$0xf0]  ;;  %v17_v29 = vld [vmem:[%s969_s0] sm:$0xf]  ;;  %v549_v30 = vor.u32 %v631_v22, %v548_v21  ;;  %v476_v31 = vld [vmem:[%s968_s2 + $0x10] sm:$0xf]  ;;  %v521_v33 = vor.u32 %v622_v24, %v518_v25 }
  0x17   :  { %358 = vmatpush.bf16.msra.mxu3 %v565_v2  ;;  %v613_v32 = vld [vmem:[%s968_s2 + $0x14] sm:$0xf0]  ;;  %v540_v34 = vld [vmem:[%s968_s2 + $0x90] sm:$0xf]  ;;  %v585_v36 = vor.u32 %v638_v26, %v582_v27  ;;  %v620_v37 = vld [vmem:[%s968_s2 + $0x54] sm:$0xf] }
  0x18   :  { %119 = vmatpush.bf16.msra.mxu0 %v421_v51  ;;  %v629_v35 = vld [vmem:[%s968_s2 + $0x94] sm:$0xf0]  ;;  %v510_v38 = vld [vmem:[%s968_s2 + $0x58] sm:$0xf0]  ;;  %v636_v39 = vld [vmem:[%s968_s2 + $0xd4] sm:$0xf]  ;;  %v477_v41 = vor.u32 %v613_v32, %v476_v31 }
  0x19   :  { %132 = vmatpush.bf16.msra.mxu1 %v425_v56  ;;  %346 = vmatpush.bf16.msra.mxu2 %v493_v14  ;;  %v574_v40 = vld [vmem:[%s968_s2 + $0xd8] sm:$0xf0]  ;;  %v541_v42 = vor.u32 %v629_v35, %v540_v34  ;;  %v513_v43 = vor.u32 %v620_v37, %v510_v38  ;;  %v618_v45 = vld [vmem:[%s968_s2 + $0x44] sm:$0xf]  ;;  %v502_v46 = vld [vmem:[%s968_s2 + $0x48] sm:$0xf0] }
  0x1a   :  { %v577_v44 = vor.u32 %v636_v39, %v574_v40  ;;  %v634_v47 = vld [vmem:[%s968_s2 + $0xc4] sm:$0xf]  ;;  %v566_v48 = vld [vmem:[%s968_s2 + $0xc8] sm:$0xf0]  ;;  %v505_v49 = vor.u32 %v618_v45, %v502_v46  ;;  %v616_v51 = vld [vmem:[%s968_s2 + $0x34] sm:$0xf] }
  0x1b   :  { %359 = vmatpush.bf16.msra.mxu3 %v557_v16  ;;  %v569_v50 = vor.u32 %v634_v47, %v566_v48  ;;  %v494_v52 = vld [vmem:[%s968_s2 + $0x38] sm:$0xf0]  ;;  %v632_v53 = vld [vmem:[%s968_s2 + $0xb4] sm:$0xf]  ;;  %v614_v57 = vld [vmem:[%s968_s2 + $0x24] sm:$0xf] }
  0x1c   :  { %120 = vmatpush.bf16.msra.mxu0 %v413_v0  ;;  %v558_v54 = vld [vmem:[%s968_s2 + $0xb8] sm:$0xf0]  ;;  %v497_v55 = vor.u32 %v616_v51, %v494_v52  ;;  %v486_v58 = vld [vmem:[%s968_s2 + $0x28] sm:$0xf0]  ;;  %v630_v59 = vld [vmem:[%s968_s2 + $0xa4] sm:$0xf] }
  0x1d   :  { %133 = vmatpush.bf16.msra.mxu1 %v417_v5  ;;  %347 = vmatpush.bf16.msra.mxu2 %v485_v28  ;;  %v561_v56 = vor.u32 %v632_v53, %v558_v54  ;;  %v550_v60 = vld [vmem:[%s968_s2 + $0xa8] sm:$0xf0]  ;;  %v489_v61 = vor.u32 %v614_v57, %v486_v58  ;;  %v612_v63 = vld [vmem:[%s968_s2 + $0x14] sm:$0xf]  ;;  %v478_v0 = vld [vmem:[%s968_s2 + $0x18] sm:$0xf0] }
  0x1e   :  { %v553_v62 = vor.u32 %v630_v59, %v550_v60  ;;  %v628_v1 = vld [vmem:[%s968_s2 + $0x94] sm:$0xf]  ;;  %v542_v2 = vld [vmem:[%s968_s2 + $0x98] sm:$0xf0]  ;;  %v481_v3 = vor.u32 %v612_v63, %v478_v0  ;;  %v468_v5 = vld [vmem:[%s968_s2] sm:$0xf] }
  0x1f   :  { %360 = vmatpush.bf16.msra.mxu3 %v549_v30  ;;  %v545_v4 = vor.u32 %v628_v1, %v542_v2  ;;  %v611_v6 = vld [vmem:[%s968_s2 + $0x4] sm:$0xf0]  ;;  %v532_v7 = vld [vmem:[%s968_s2 + $0x80] sm:$0xf]  ;;  %v610_v10 = vld [vmem:[%s968_s2 + $0x4] sm:$0xf] }
  0x20   :  { %121 = vmatpush.bf16.msra.mxu0 %v405_v15  ;;  %v469_v8 = vor.u32 %v611_v6, %v468_v5  ;;  %v627_v9 = vld [vmem:[%s968_s2 + $0x84] sm:$0xf0]  ;;  %v470_v11 = vld [vmem:[%s968_s2 + $0x8] sm:$0xf0]  ;;  %v626_v14 = vld [vmem:[%s968_s2 + $0x84] sm:$0xf] }
  0x21   :  { %134 = vmatpush.bf16.msra.mxu1 %v409_v19  ;;  %348 = vmatpush.bf16.msra.mxu2 %v477_v41  ;;  %v533_v12 = vor.u32 %v627_v9, %v532_v7  ;;  %v473_v13 = vor.u32 %v610_v10, %v470_v11  ;;  %v534_v15 = vld [vmem:[%s968_s2 + $0x88] sm:$0xf0]  ;;  %v176_v25 = vld [vmem:[%s970_s3] sm:$0x3] }
  0x22   :  { %v537_v16 = vor.u32 %v626_v14, %v534_v15  ;;  %v179_v26 = vperm.slane %v176_v25, 1  ;;  %v178_v31 = vperm.slane %v176_v25, 0 }
  0x23   :  { %122 = vmatmul.bf16.vlgmr.msra.gmra.mxu0 %v17_v29  ;;  %361 = vmatpush.bf16.msra.mxu3 %v541_v42 }
  0x24   :  { %368 = vmatpush.bf16.msrb.mxu0 %v529_v20  ;;  %135 = vmatmul.bf16.vlgmr.msra.gmra.mxu1 %v17_v29 }
  0x25   :  { %381 = vmatpush.bf16.msrb.mxu1 %v593_v23  ;;  %349 = vmatpush.bf16.msra.mxu2 %v469_v8 }
  0x27   :  { %362 = vmatpush.bf16.msra.mxu3 %v533_v12 }
  0x28   :  { %369 = vmatpush.bf16.msrb.mxu0 %v521_v33 }
  0x29   :  { %382 = vmatpush.bf16.msrb.mxu1 %v585_v36 }
  0x2c   :  { %370 = vmatpush.bf16.msrb.mxu0 %v513_v43 }
  0x2d   :  { %383 = vmatpush.bf16.msrb.mxu1 %v577_v44 }
  0x30   :  { %371 = vmatpush.bf16.msrb.mxu0 %v505_v49 }
  0x31   :  { %384 = vmatpush.bf16.msrb.mxu1 %v569_v50 }
  0x34   :  { %372 = vmatpush.bf16.msrb.mxu0 %v497_v55 }
  0x35   :  { %385 = vmatpush.bf16.msrb.mxu1 %v561_v56 }
  0x38   :  { %373 = vmatpush.bf16.msrb.mxu0 %v489_v61 }
  0x39   :  { %386 = vmatpush.bf16.msrb.mxu1 %v553_v62 }
  0x3c   :  { %374 = vmatpush.bf16.msrb.mxu0 %v481_v3 }
  0x3d   :  { %387 = vmatpush.bf16.msrb.mxu1 %v545_v4 }
  0x40   :  { %375 = vmatpush.bf16.msrb.mxu0 %v473_v13 }
  0x41   :  { %388 = vmatpush.bf16.msrb.mxu1 %v537_v16 }
  0xa0   :  { %v123_v17 = vpop.f32.mrf.mxu0 }
  0xa1   :  { %v140_v18 = vmax.f32 %v123_v17, 0.0  ;;  %v136_v19 = vpop.f32.mrf.mxu1 }
  0xa2   :  { %v141_v20 = vmax.f32 %v136_v19, 0.0 }
  0xa3   :  { %v142_v21 = vpack.c.bf16 %v140_v18, %v140_v18 }
  0xa4   :  { %v143_v22 = vpack.c.bf16 %v141_v20, %v141_v20 }
  0xa5   :  { %350 = vmatmul.bf16.vlgmr.msra.gmra.mxu2 %v142_v21  ;;  %376 = vmatmul.bf16.vlgmr.msrb.gmra.mxu0 %v142_v21 }
  0xa6   :  { %363 = vmatmul.bf16.vlgmr.msra.gmra.mxu3 %v143_v22  ;;  %389 = vmatmul.bf16.vlgmr.msrb.gmra.mxu1 %v143_v22 }
  0xa8   :  { %v125_v23 = vpop.f32.mrf.mxu0 }
  0xa9   :  { %v138_v24 = vpop.f32.mrf.mxu1 }
 0x122   :  { %v377_v27 = vpop.f32.mrf.mxu0 }
 0x123   :  { %v378_v28 = vadd.f32 %v377_v27, %v179_v26  ;;  %v390_v29 = vpop.f32.mrf.mxu1 }
 0x125   :  { %v391_v30 = vadd.f32 %v390_v29, %v378_v28 }
 0x127   :  { %v395_v32 = vmax.f32 %v391_v30, 0.0 }
 0x128   :  { %v351_v33 = vpop.f32.mrf.mxu2 }
 0x129   :  { %397 = vst [vmem:[%s971_s4 + $0x8] sm:$0xff] %v395_v32  ;;  %v352_v34 = vadd.f32 %v351_v33, %v178_v31  ;;  %v364_v35 = vpop.f32.mrf.mxu3 }
 0x12a   :  { %v379_v36 = vpop.f32.mrf.mxu0 }
 0x12b   :  { %v365_v37 = vadd.f32 %v364_v35, %v352_v34  ;;  %v392_v38 = vpop.f32.mrf.mxu1 }
 0x12d   :  { %v394_v39 = vmax.f32 %v365_v37, 0.0 }
 0x12f   :  { %396 = vst [vmem:[%s971_s4] sm:$0xff] %v394_v39 }
 0x130   :  { %v353_v40 = vpop.f32.mrf.mxu2 }
 0x131   :  { %v366_v41 = vpop.f32.mrf.mxu3 }

</bundles_post_ra>
